<compile_context>
chip_gen: v7x
topology: tpu7x:2x2x1
jax: 0.10.0
libtpu: 0.0.40
codegen_flags: <defaults>
</compile_context>

<pallas_src>
import functools

import jax
import jax.numpy as jnp
from jax import lax
from jax.experimental import pallas as pl
from jax.experimental.pallas import tpu as pltpu

_MIB = 1024 * 1024


def _tv_kernel(wmask_ref, x_ref, out_ref, *, w, n_total, nt, ragged):
    """One grid step over `nt` flattened planes of length L = H*W.

    wmask_ref: (1, L) f32 keep-mask for the width direction
               (1.0 where lane % W != 0, i.e. a real left-neighbour pair).
    x_ref:     (nt, L) input block in its original dtype.
    out_ref:   (1, 8, 128) f32 tile; sublane 0 = H-direction partial sum,
               sublane 1 = W-direction partial sum (lane-dense store).
    """
    x = x_ref[...].astype(jnp.float32)
    L = x.shape[1]

    lane = lax.broadcasted_iota(jnp.int32, (1, L), 1)
    keep_w = wmask_ref[...] > 0.5          # (1, L): lane % W != 0
    keep_h = lane >= w                     # (1, L): lane >= W

    if ragged:
        # Tail block: planes >= n_total hold unspecified out-of-bounds data.
        n = pl.program_id(0)
        valid = jnp.minimum(n_total - n * nt, nt)
        plane_keep = lax.broadcasted_iota(jnp.int32, (nt, 1), 0) < valid
        keep_w = jnp.logical_and(keep_w, plane_keep)
        keep_h = jnp.logical_and(keep_h, plane_keep)

    # Width direction: |x[k] - x[k-1]| kept where k % W != 0 (lane roll by 1).
    dw = jnp.abs(x - pltpu.roll(x, 1, 1))
    # Height direction: |x[k] - x[k-W]| kept where k >= W (lane roll by W).
    dh = jnp.abs(x - pltpu.roll(x, w, 1))

    sum_w = jnp.sum(jnp.where(keep_w, dw, 0.0))
    sum_h = jnp.sum(jnp.where(keep_h, dh, 0.0))

    sub = lax.broadcasted_iota(jnp.int32, (1, 8, 128), 1)
    out_ref[...] = jnp.where(sub == 0, sum_h, sum_w)


def _vmem_budget():
    """(capacity, vmem_limit_bytes, target input-block bytes) for this chip."""
    cap = None
    try:
        info = pltpu.get_tpu_info()
        cap = int(getattr(info, "vmem_capacity_bytes", 0)) or None
    except Exception:
        cap = None
    if cap is None:
        cap = 64 * _MIB                       # conservative: v7x per-TC VMEM
    vmem_limit = max(min(cap - 16 * _MIB, 64 * _MIB), 32 * _MIB)
    target_bytes = min(max(vmem_limit // 10, 2 * _MIB), 8 * _MIB)
    return cap, vmem_limit, target_bytes


def total_variation(imgs, reduce="mean", block_planes=None):
    """imgs: (B, C, H, W) array (NCHW, any float dtype). Returns scalar f32."""
    assert reduce in ("sum", "mean"), f"Unsupported reduce [{reduce}]"
    B, C, H, W = imgs.shape
    N = B * C
    L = H * W
    # Lane-dense flattening: each plane becomes one length-L row, so the lane
    # axis is fully used for any W.  This contiguous-dim merge is a free
    # reshape in XLA (no HBM copy).
    x = imgs.reshape(N, L)

    cap, vmem_limit, target_bytes = _vmem_budget()
    plane_bytes = L * jnp.dtype(imgs.dtype).itemsize

    if block_planes is None:
        planes_fit = max(1, target_bytes // plane_bytes)
    else:
        planes_fit = max(1, int(block_planes))
    # Sublane-dim constraint: nt must be a multiple of 8 or equal to N.
    if planes_fit >= N or N < 8:
        nt = N
    else:
        nt = min(max(8, (planes_fit // 8) * 8), (N // 8) * 8)
    nt = int(nt)
    num_blocks = (N + nt - 1) // nt
    ragged = (num_blocks * nt) != N

    # Keep the f32 working set (double-buffered input + diff temps) within the
    # VMEM limit when the minimum 8-plane block already exceeds the target.
    est_need = 2 * nt * plane_bytes + 5 * nt * L * 4
    if est_need > vmem_limit:
        vmem_limit = min(est_need + 2 * _MIB, max(cap - 8 * _MIB, vmem_limit))
    # TODO(synk): for planes too large for even an 8-plane block (e.g.
    # 2048x2048 f32 on v7x's 64 MiB VMEM), add intra-plane tiling with a
    # one-row halo instead of just raising vmem_limit.

    # Width-direction wrap-around seam keep-mask, built with plain XLA (avoids
    # in-kernel integer mod) and DMA'd once (constant index_map).
    keep_w = (jnp.arange(L, dtype=jnp.int32) % W != 0)
    keep_w = keep_w.astype(jnp.float32).reshape(1, L)

    kernel = functools.partial(_tv_kernel, w=W, n_total=N, nt=nt, ragged=ragged)

    out_bytes = num_blocks * 8 * 128 * 4
    cost = pl.CostEstimate(
        flops=4 * N * H * W,
        transcendentals=0,
        bytes_accessed=int(N * L * jnp.dtype(imgs.dtype).itemsize + L * 4 + out_bytes),
    )

    partials = pl.pallas_call(
        kernel,
        out_shape=jax.ShapeDtypeStruct((num_blocks, 8, 128), jnp.float32),
        grid_spec=pltpu.PrefetchScalarGridSpec(
            num_scalar_prefetch=0,
            grid=(num_blocks,),
            in_specs=[
                pl.BlockSpec((1, L), lambda n: (0, 0)),    # seam mask (constant)
                pl.BlockSpec((nt, L), lambda n: (n, 0)),   # nt planes per step
            ],
            out_specs=pl.BlockSpec((1, 8, 128), lambda n: (n, 0, 0)),
        ),
        compiler_params=pltpu.CompilerParams(
            dimension_semantics=("parallel",),
            vmem_limit_bytes=int(vmem_limit),
        ),
        cost_estimate=cost,
    )(keep_w, x)

    # Tiny final tree-reduction + normalisation in plain JAX.
    sum_h = jnp.sum(partials[:, 0, 0])
    sum_w = jnp.sum(partials[:, 1, 0])
    if reduce == "sum":
        return sum_h + sum_w
    # Matches the PyTorch module exactly (including the divide-by-zero the
    # reference module would also produce if H == 1 or W == 1).
    count_h = C * (H - 1) * W
    count_w = C * H * (W - 1)
    return (sum_h / count_h + sum_w / count_w) / B


def _reference(imgs, reduce="mean"):
    imgs = imgs.astype(jnp.float32)
    abs_difh = jnp.abs(imgs[:, :, 1:, :] - imgs[:, :, :-1, :])
    abs_difw = jnp.abs(imgs[:, :, :, 1:] - imgs[:, :, :, :-1])
    if reduce == "sum":
        return abs_difh.sum() + abs_difw.sum()
    B, C, H, W = imgs.shape
    count_h = C * (H - 1) * W
    count_w = C * H * (W - 1)
    return (abs_difh.sum() / count_h + abs_difw.sum() / count_w) / B


if __name__ == "__main__":
    key = jax.random.PRNGKey(0)
    x = jax.random.normal(key, (2, 4, 16, 16), dtype=jnp.float32)

    loss_mean = jax.block_until_ready(total_variation(x, reduce="mean"))
    loss_sum = jax.block_until_ready(total_variation(x, reduce="sum"))
    ref_mean = _reference(x, reduce="mean")
    ref_sum = _reference(x, reduce="sum")
    assert jnp.allclose(loss_mean, ref_mean, rtol=1e-5, atol=1e-5), (loss_mean, ref_mean)
    assert jnp.allclose(loss_sum, ref_sum, rtol=1e-5, atol=1e-5), (loss_sum, ref_sum)

    # Ragged multi-block path: N=15 planes, 8 planes/block -> 2 blocks, the
    # second block has 7 valid planes (tail masked in-kernel, no jnp.pad).
    x2 = jax.random.normal(jax.random.PRNGKey(1), (3, 5, 16, 16), dtype=jnp.float32)
    got2 = jax.block_until_ready(total_variation(x2, reduce="mean", block_planes=8))
    want2 = _reference(x2, reduce="mean")
    assert jnp.allclose(got2, want2, rtol=1e-5, atol=1e-5), (got2, want2)

    # Non-square plane, W not a power of two (lane-dense flattened layout).
    x3 = jax.random.normal(jax.random.PRNGKey(2), (2, 3, 16, 24), dtype=jnp.float32)
    got3 = jax.block_until_ready(total_variation(x3, reduce="sum"))
    want3 = _reference(x3, reduce="sum")
    assert jnp.allclose(got3, want3, rtol=1e-5, atol=1e-5), (got3, want3)

    # bf16 ingestion (halves HBM traffic; diffs/accumulation stay f32 in-kernel).
    xb = x.astype(jnp.bfloat16)
    loss_bf16 = jax.block_until_ready(total_variation(xb, reduce="mean"))
    ref_bf16 = _reference(xb, reduce="mean")
    assert jnp.allclose(loss_bf16, ref_bf16, rtol=1e-5, atol=1e-5), (loss_bf16, ref_bf16)

    print("KERNEL_OK")
</pallas_src>

<mosaic_0001>
module attributes {stable_mosaic.version = 11 : i64} {
  func.func @_tv_kernel(%arg0: i32, %arg1: memref<1x256xf32, #tpu.memory_space<vmem>>, %arg2: memref<8x256xf32, #tpu.memory_space<vmem>>, %arg3: memref<1x8x128xf32, #tpu.memory_space<vmem>>) attributes {dimension_semantics = [#tpu.dimension_semantics<parallel>], iteration_bounds = array<i64: 1>, scalar_prefetch = 0 : i64, scratch_operands = 0 : i64, tpu.core_type = #tpu.core_type<tc>, window_params = [{pipeline_mode = #tpu.pipeline_mode<synchronous>, transform_indices = @transform_0, window_bounds = array<i64: 1, 256>}, {transform_indices = @transform_1, window_bounds = array<i64: 8, 256>}, {transform_indices = @transform_2, window_bounds = array<i64: 1, 8, 128>}]} {
    %c0 = arith.constant 0 : index
    %c0_0 = arith.constant 0 : index
    %0 = vector.load %arg2[%c0, %c0_0] : memref<8x256xf32, #tpu.memory_space<vmem>>, vector<8x256xf32>
    %1 = tpu.iota {dimensions = array<i32: 1>} : vector<1x256xi32>
    %c0_1 = arith.constant 0 : index
    %c0_2 = arith.constant 0 : index
    %2 = vector.load %arg1[%c0_1, %c0_2] : memref<1x256xf32, #tpu.memory_space<vmem>>, vector<1x256xf32>
    %cst = arith.constant 5.000000e-01 : f32
    %3 = vector.broadcast %cst : f32 to vector<1x256xf32>
    %4 = arith.cmpf ogt, %2, %3 : vector<1x256xf32>
    %c16_i32 = arith.constant 16 : i32
    %5 = vector.broadcast %c16_i32 : i32 to vector<1x256xi32>
    %6 = arith.cmpi sge, %1, %5 : vector<1x256xi32>
    %c1_i32 = arith.constant 1 : i32
    %7 = tpu.dynamic_rotate %0 by %c1_i32 dim 1 : vector<8x256xf32>, i32 -> vector<8x256xf32>
    %8 = arith.subf %0, %7 : vector<8x256xf32>
    %9 = math.absf %8 : vector<8x256xf32>
    %c16_i32_3 = arith.constant 16 : i32
    %10 = tpu.dynamic_rotate %0 by %c16_i32_3 dim 1 : vector<8x256xf32>, i32 -> vector<8x256xf32>
    %11 = arith.subf %0, %10 : vector<8x256xf32>
    %12 = math.absf %11 : vector<8x256xf32>
    %cst_4 = arith.constant 0.000000e+00 : f32
    %13 = vector.shape_cast %4 : vector<1x256xi1> to vector<1x256xi1>
    %14 = vector.broadcast %13 : vector<1x256xi1> to vector<8x256xi1>
    %15 = vector.broadcast %cst_4 : f32 to vector<8x256xf32>
    %16 = arith.select %14, %9, %15 : vector<8x256xi1>, vector<8x256xf32>
    %17 = vector.shape_cast %16 : vector<8x256xf32> to vector<1x8x256xf32>
    %cst_5 = arith.constant dense<0.000000e+00> : vector<1xf32>
    %18 = vector.multi_reduction <add>, %17, %cst_5 [1, 2] : vector<1x8x256xf32> to vector<1xf32>
    %19 = vector.shape_cast %18 : vector<1xf32> to vector<1x1x1xf32>
    %20 = vector.extract %19[0, 0, 0] : f32 from vector<1x1x1xf32>
    %cst_6 = arith.constant 0.000000e+00 : f32
    %21 = vector.shape_cast %6 : vector<1x256xi1> to vector<1x256xi1>
    %22 = vector.broadcast %21 : vector<1x256xi1> to vector<8x256xi1>
    %23 = vector.broadcast %cst_6 : f32 to vector<8x256xf32>
    %24 = arith.select %22, %12, %23 : vector<8x256xi1>, vector<8x256xf32>
    %25 = vector.shape_cast %24 : vector<8x256xf32> to vector<1x8x256xf32>
    %cst_7 = arith.constant dense<0.000000e+00> : vector<1xf32>
    %26 = vector.multi_reduction <add>, %25, %cst_7 [1, 2] : vector<1x8x256xf32> to vector<1xf32>
    %27 = vector.shape_cast %26 : vector<1xf32> to vector<1x1x1xf32>
    %28 = vector.extract %27[0, 0, 0] : f32 from vector<1x1x1xf32>
    %29 = tpu.iota {dimensions = array<i32: 1>} : vector<1x8x128xi32>
    %c0_i32 = arith.constant 0 : i32
    %30 = vector.broadcast %c0_i32 : i32 to vector<1x8x128xi32>
    %31 = arith.cmpi eq, %29, %30 : vector<1x8x128xi32>
    %32 = vector.broadcast %28 : f32 to vector<1x8x128xf32>
    %33 = vector.broadcast %20 : f32 to vector<1x8x128xf32>
    %34 = arith.select %31, %32, %33 : vector<1x8x128xi1>, vector<1x8x128xf32>
    %c0_8 = arith.constant 0 : index
    %c0_9 = arith.constant 0 : index
    %c0_10 = arith.constant 0 : index
    %35 = vector.load %arg3[%c0_8, %c0_9, %c0_10] : memref<1x8x128xf32, #tpu.memory_space<vmem>>, vector<1x8x128xf32>
    tpu.vector_store %arg3[%c0_8, %c0_9, %c0_10], %34 {strides = array<i32>} : memref<1x8x128xf32, #tpu.memory_space<vmem>>, vector<1x8x128xf32>,
    return
  }
  func.func @transform_0(%arg0: i32) -> (i32, i32) {
    %c0_i32 = arith.constant 0 : i32
    %c0_i32_0 = arith.constant 0 : i32
    %c0_i32_1 = arith.constant 0 : i32
    return %c0_i32, %c0_i32_0 : i32, i32
  }
  func.func @transform_1(%arg0: i32) -> (i32, i32) {
    %c0_i32 = arith.constant 0 : i32
    %c0_i32_0 = arith.constant 0 : i32
    return %arg0, %c0_i32 : i32, i32
  }
  func.func @transform_2(%arg0: i32) -> (i32, i32, i32) {
    %c0_i32 = arith.constant 0 : i32
    %c0_i32_0 = arith.constant 0 : i32
    %c0_i32_1 = arith.constant 0 : i32
    return %arg0, %c0_i32, %c0_i32_0 : i32, i32, i32
  }
}

</mosaic_0001>

<bundles_post_ra>
// kernel: tpu_custom_call.1
= control target key start
LH: loop header
LB: loop body
LE: loop exit
PB: predicated region body
PF: predicated region fallthrough
CT: control target
= control target key end

     0   :  { %7 = vsyncpa [#allocation3], 0  ;;  %s273_s0 = inlined_call_operand.hbm [shape: f32[1,256], index: 0, kind: input, shape index: {}]   ;;  %s274_s1 = inlined_call_operand.hbm [shape: f32[8,256], index: 1, kind: input, shape index: {}]   ;;  %s275_s2 = inlined_call_operand.hbm [shape: f32[1,8,128], index: 2, kind: output, shape index: {}]  }
   0x1   :  { %8 = vsyncpa [#allocation6], 0 }
   0x2   :  { %9 = vsyncpa [#allocation4], 0  ;;  %s211_s9 = smov [#allocation2]   ;;  %s212_s11 = smov [#allocation5]  }
   0x3   :  { %s16_s10 = sshll.u32 %s211_s9, 4  ;;  %s26_s12 = sshll.u32 %s212_s11, 4  ;;  %s17_s10 = int_to_ptr.vmem [resolvable:$true] %s16_s10  ;;  %s27_s12 = int_to_ptr.vmem [resolvable:$true] %s26_s12 }
   0x4   :  { %s139_s15 = scalar_lea.hbm %s273_s0, 32 }
   0x5   :  { %p140_p0 = scmp.ne.s32.totalorder %s273_s0, %s139_s15  ;;  %p143_p1 = scmp.lt.u32.totalorder %s139_s15, %s273_s0 }
   0x7   :  { %p145_p2 = pnand %p143_p1, %p140_p0 }
   0x9   :  { %148 = shalt.err (!%p145_p2)
}
   0xa   :  { %s149_s20 = scalar_lea.vmem %s17_s10, 32  ;;  %p154_p4 = scmp.lt.s32.totalorder %s17_s10, %s17_s10 }
   0xb   :  { %p150_p3 = scmp.ne.s32.totalorder %s17_s10, %s149_s20  ;;  %p155_p5 = scmp.lt.s32.totalorder %s149_s20, %s149_s20 }
   0xd   :  { %p156_p6 = por %p155_p5, %p154_p4 }
   0xf   :  { %p157_p7 = pnand %p156_p6, %p150_p3 }
  0x11   :  { %160 = shalt.err (!%p157_p7)
}
  0x12   :  { %19 = dma.hbm_to_vmem [thread:$0]  %s273_s0, 32, %s17_s10, [#allocation3]  }
  0x13   :  { %s161_s25 = scalar_lea.hbm %s274_s1, 256 }
  0x14   :  { %p162_p8 = scmp.ne.s32.totalorder %s274_s1, %s161_s25  ;;  %p165_p9 = scmp.lt.u32.totalorder %s161_s25, %s274_s1 }
  0x16   :  { %p167_p10 = pnand %p165_p9, %p162_p8 }
  0x18   :  { %170 = shalt.err (!%p167_p10)
}
  0x19   :  { %s171_s30 = scalar_lea.vmem %s27_s12, 256  ;;  %p176_p12 = scmp.lt.s32.totalorder %s27_s12, %s27_s12 }
  0x1a   :  { %p172_p11 = scmp.ne.s32.totalorder %s27_s12, %s171_s30  ;;  %p177_p13 = scmp.lt.s32.totalorder %s171_s30, %s171_s30 }
  0x1c   :  { %p178_p0 = por %p177_p13, %p176_p12 }
  0x1e   :  { %p179_p1 = pnand %p178_p0, %p172_p11 }
  0x20   :  { %182 = shalt.err (!%p179_p1)
}
  0x21   :  { %29 = dma.hbm_to_vmem [thread:$0]  %s274_s1, 256, %s27_s12, [#allocation6]  }
  0x22   :  { %205 = dma.done.wait [#allocation3], 32  }
  0x23   :  { %206 = vsyncadd [#allocation3], 4294967264 }
  0x24   :  { %207 = dma.done.wait [#allocation6], 256  }
  0x25   :  { %208 = vsyncadd [#allocation6], 4294967040  ;;  %v36_v0 = vld [vmem:[#allocation5] sm:$0xff]  ;;  %s213_s4 = smov 16   ;;  %s214_s5 = smov 1   ;;  %v37_v1 = vld [vmem:[#allocation5 + $0x8] sm:$0xff]  ;;  %v38_v2 = vlaneseq }
  0x26   :  { %56 = vrot.lane.b32.xlu1 %v36_v0, %s213_s4  ;;  %45 = vrot.lane.b32.xlu0 %v36_v0, %s214_s5  ;;  %v41_v3 = vld [vmem:[#allocation2] sm:$0x3]  ;;  %v215_v10 = vmov 0   ;;  %s216_s1 = smov [#allocation7]  }
  0x27   :  { %v256_v4 = vshrl.u32 %v38_v2, 7  ;;  %vm42_vm0 = vcmp.gt.f32.partialorder %v41_v3, 0.5  ;;  %v39_v5 = vand.u32 127, %v38_v2  ;;  %s119_s6 = sshll.u32 %s216_s1, 4  ;;  %s120_s6 = int_to_ptr.vmem [resolvable:$true] %s119_s6 }
  0x28   :  { %v67_v11 = vsel %vm42_vm0, 1, %v215_v10  ;;  %s183_s9 = scalar_lea.vmem %s120_s6, 128  ;;  %p188_p3 = scmp.lt.s32.totalorder %s120_s6, %s120_s6 }
  0x29   :  { %v70_v6 = vsub.s32 0, %v256_v4  ;;  %v74_v7 = vsub.s32 1, %v256_v4  ;;  %vm60_vm1 = vcmp.lt.s32.totalorder %v39_v5, 16  ;;  %vm49_vm2 = vcmp.lt.s32.totalorder %v39_v5, 1  ;;  %p184_p2 = scmp.ne.s32.totalorder %s120_s6, %s183_s9  ;;  %p189_p4 = scmp.lt.s32.totalorder %s183_s9, %s183_s9 }
  0x2a   :  { %58 = vrot.lane.b32.xlu1 %v37_v1, %s213_s4  ;;  %47 = vrot.lane.b32.xlu0 %v37_v1, %s214_s5  ;;  %vm43_vm3 = vcmp.ge.s32.totalorder %v39_v5, 16  ;;  %vm108_vm6 = vcmp.eq.s32.totalorder %v256_v4, 0 }
  0x2b   :  { %v71_v12 = vrot.slane %v67_v11, %v70_v6  ;;  %v75_v13 = vrot.slane %v67_v11, %v74_v7  ;;  %p190_p5 = por %p189_p4, %p188_p3 }
  0x2d   :  { %vm76_vm4 = vcmp.eq.s32.totalorder %v71_v12, 1  ;;  %vm77_vm5 = vcmp.eq.s32.totalorder %v75_v13, 1  ;;  %p191_p6 = pnand %p190_p5, %p184_p2 }
  0x98   :  { %v57_v8 = vpop.permute.xlu1 %56  ;;  %v46_v9 = vpop.permute.xlu0 %45 }
  0x9c   :  { %v59_v14 = vpop.permute.xlu1 %58  ;;  %v48_v15 = vpop.permute.xlu0 %47 }
  0x9d   :  { %v61_v16 = vsel %vm60_vm1, %v57_v8, %v59_v14  ;;  %v62_v17 = vsel %vm60_vm1, %v59_v14, %v57_v8  ;;  %v50_v18 = vsel %vm49_vm2, %v46_v9, %v48_v15  ;;  %v51_v19 = vsel %vm49_vm2, %v48_v15, %v46_v9 }
  0x9e   :  { %v63_v20 = vsub.f32 %v36_v0, %v62_v17  ;;  %v64_v21 = vsub.f32 %v37_v1, %v61_v16  ;;  %v52_v22 = vsub.f32 %v36_v0, %v51_v19  ;;  %v53_v23 = vsub.f32 %v37_v1, %v50_v18 }
  0xa0   :  { %v65_v24 = vand.u32 2147483647, %v63_v20  ;;  %v66_v25 = vand.u32 2147483647, %v64_v21  ;;  %v54_v26 = vand.u32 2147483647, %v52_v22 }
  0xa1   :  { %v55_v27 = vand.u32 2147483647, %v53_v23 }
  0xa2   :  { %v94_v28 = vsel %vm43_vm3, %v65_v24, 0.0  ;;  %v78_v29 = vsel %vm76_vm4, %v54_v26, 0.0 }
  0xa3   :  { %v96_v30 = vadd.f32 %v94_v28, %v66_v25  ;;  %v79_v31 = vsel %vm77_vm5, %v55_v27, 0.0 }
  0xa4   :  { %v80_v32 = vadd.f32 %v79_v31, %v78_v29 }
  0xa5   :  { %97 = vadd.xlane.f32.xlu1 %v96_v30 }
  0xa6   :  { %81 = vadd.xlane.f32.xlu0 %v80_v32 }
 0x132   :  { %v98_v33 = vpop.xlane.xlu1 %97 }
 0x133   :  { %v99_v34 = vrot.slane %v98_v33, 4  ;;  %v82_v35 = vpop.xlane.xlu0 %81 }
 0x134   :  { %v83_v36 = vrot.slane %v82_v35, 4 }
 0x135   :  { %v100_v37 = vadd.f32 %v99_v34, %v98_v33 }
 0x136   :  { %v84_v38 = vadd.f32 %v83_v36, %v82_v35 }
 0x137   :  { %v101_v39 = vrot.slane %v100_v37, 2 }
 0x138   :  { %v85_v40 = vrot.slane %v84_v38, 2 }
 0x139   :  { %v102_v41 = vadd.f32 %v101_v39, %v100_v37 }
 0x13a   :  { %v86_v42 = vadd.f32 %v85_v40, %v84_v38 }
 0x13b   :  { %v103_v43 = vrot.slane %v102_v41, 1 }
 0x13c   :  { %v87_v44 = vrot.slane %v86_v42, 1 }
 0x13d   :  { %v104_v45 = vadd.f32 %v103_v43, %v102_v41 }
 0x13e   :  { %v88_v46 = vadd.f32 %v87_v44, %v86_v42 }
 0x140   :  { %129 = vpush %v88_v46 }
 0x141   :  { %131 = vpush %v104_v45 }
 0x171   :  { %s130_s7 = spop %129 }
 0x172   :  { %v110_v47 = vstv %s130_s7  ;;  %s132_s8 = spop %131 }
 0x173   :  { %v109_v48 = vstv %s132_s8 }
 0x174   :  { %v111_v49 = vsel %vm108_vm6, %v109_v48, %v110_v47 }
 0x175   :  { %112 = vst [vmem:[#allocation7] sm:$0xff] %v111_v49 }
 0x176   :  { %194 = shalt.err (!%p191_p6)
}
 0x177   :  { %s195_s12 = scalar_lea.hbm %s275_s2, 128 }
 0x178   :  { %p196_p7 = scmp.ne.s32.totalorder %s275_s2, %s195_s12  ;;  %p199_p8 = scmp.lt.u32.totalorder %s195_s12, %s275_s2 }
 0x17a   :  { %p201_p9 = pnand %p199_p8, %p196_p7 }
 0x17c   :  { %204 = shalt.err (!%p201_p9)
}
 0x17d   :  { %122 = dma.vmem_to_hbm [thread:$0]  %s120_s6, 128, %s275_s2, [#allocation4]  }
 0x17e   :  { %209 = dma.done.wait [#allocation4], 128  }
 0x17f   :  { %210 = vsyncadd [#allocation4], 4294967168 }
 0x180   :  { %126 = vsyncpa [#allocation3], 1 }
 0x181   :  { %127 = vsyncpa [#allocation6], 1 }
 0x182   :  { %128 = vsyncpa [#allocation4], 1 }

</bundles_post_ra>
